<compile_context>
chip_gen: v7x
topology: tpu7x:2x2x1
jax: 0.10.0
libtpu: 0.0.40
codegen_flags: <defaults>
</compile_context>

<pallas_src>
import numpy as np
import jax
import jax.numpy as jnp
from jax.experimental import pallas as pl
from jax.experimental.pallas import tpu as pltpu


def _round_up(x: int, m: int) -> int:
    return ((x + m - 1) // m) * m


def make_seasonality_bases(harmonics: int, backcast_size: int, forecast_size: int):
    """Deterministic basis construction, identical to the PyTorch __init__ (numpy only)."""
    frequency = np.append(
        np.zeros(1, dtype=float),
        np.arange(harmonics, harmonics / 2 * forecast_size, dtype=float) / harmonics,
    )[None, :]
    backcast_grid = (
        -2 * np.pi * (np.arange(backcast_size, dtype=float)[:, None] / forecast_size) * frequency
    )
    forecast_grid = (
        2 * np.pi * (np.arange(forecast_size, dtype=float)[:, None] / forecast_size) * frequency
    )
    backcast_basis = np.concatenate(
        [np.transpose(np.cos(backcast_grid)), np.transpose(np.sin(backcast_grid))], axis=0
    ).astype(np.float32)  # [P, backcast_size]
    forecast_basis = np.concatenate(
        [np.transpose(np.cos(forecast_grid)), np.transpose(np.sin(forecast_grid))], axis=0
    ).astype(np.float32)  # [P, forecast_size]
    return backcast_basis, forecast_basis


def _seasonality_kernel(theta_ref, back_basis_ref, fore_basis_ref, back_ref, fore_ref):
    # theta tile is read once; two small MXU matmuls against the VMEM-resident,
    # zero-extended [2P, *] bases.  No in-kernel slicing of theta or of the
    # output (both stores are full-width on their arrays).  f32 accumulation.
    theta = theta_ref[...]
    back_ref[...] = jnp.dot(
        theta, back_basis_ref[...], preferred_element_type=jnp.float32
    ).astype(back_ref.dtype)
    fore_ref[...] = jnp.dot(
        theta, fore_basis_ref[...], preferred_element_type=jnp.float32
    ).astype(fore_ref.dtype)


def seasonality_basis_forward(theta, back_basis_k, fore_basis_k, block_b: int = 8192):
    """theta: [B, 2P]; back_basis_k: [2P, back_len]; fore_basis_k: [2P, fore_len].

    Returns (backcast [B, back_len], forecast [B, fore_len]).
    """
    B, K = theta.shape
    Kb, back_len = back_basis_k.shape
    Kf, fore_len = fore_basis_k.shape
    assert K == Kb == Kf, "theta columns must match the (zero-extended) basis rows"

    # Batch tiling:
    #  - large B: 8192-row tiles (per-step overhead < 10%), double-buffered by BlockSpec.
    #  - small B: split into >=2 grid steps (multiple of 8) so both v7x TCs get work;
    #    fall back to a single full block only when B itself is tiny.
    if B <= block_b:
        half = _round_up(-(-B // 2), 8)
        tb = half if half < B else B
    else:
        tb = block_b
    grid = (pl.cdiv(B, tb),)

    elem = jnp.dtype(theta.dtype).itemsize
    tile_bytes = tb * (K + back_len + fore_len) * elem
    basis_bytes = K * (back_len + fore_len) * elem
    # Explicit scoped-VMEM budget (v5e defaults to 16 MiB); clamp well under v7x's 64 MiB.
    vmem_limit = int(min(max(2 * tile_bytes + basis_bytes + (2 << 20), 32 << 20), 48 << 20))

    cost = pl.CostEstimate(
        flops=2 * B * K * (back_len + fore_len),
        transcendentals=0,
        bytes_accessed=(B * K + K * (back_len + fore_len) + B * (back_len + fore_len)) * elem,
    )

    backcast, forecast = pl.pallas_call(
        _seasonality_kernel,
        out_shape=(
            jax.ShapeDtypeStruct((B, back_len), theta.dtype),
            jax.ShapeDtypeStruct((B, fore_len), theta.dtype),
        ),
        grid=grid,
        in_specs=[
            pl.BlockSpec((tb, K), lambda i: (i, 0)),           # theta tile (pipelined)
            pl.BlockSpec((Kb, back_len), lambda i: (0, 0)),    # basis resident in VMEM
            pl.BlockSpec((Kf, fore_len), lambda i: (0, 0)),    # basis resident in VMEM
        ],
        out_specs=(
            pl.BlockSpec((tb, back_len), lambda i: (i, 0)),    # unpadded backcast tile
            pl.BlockSpec((tb, fore_len), lambda i: (i, 0)),    # unpadded forecast tile
        ),
        compiler_params=pltpu.CompilerParams(
            # TODO(synk): on v7x, pltpu.CORE_PARALLEL on this axis can split the
            # batch across the two TensorCores; "parallel" kept for portability.
            dimension_semantics=("parallel",),
            vmem_limit_bytes=vmem_limit,
        ),
        cost_estimate=cost,
    )(theta, back_basis_k, fore_basis_k)
    return backcast, forecast


class SeasonalityBasis:
    """JAX/Pallas equivalent of the PyTorch SeasonalityBasis module."""

    def __init__(self, harmonics: int, backcast_size: int, forecast_size: int,
                 dtype=jnp.float32, block_b: int = 8192):
        bb, fb = make_seasonality_bases(harmonics, backcast_size, forecast_size)
        P, back_len = bb.shape
        Pf, fore_len = fb.shape
        assert P == Pf
        self.cut_point = P
        self.block_b = block_b
        # Original bases (for reference / introspection).
        self.backcast_basis = jnp.asarray(bb, dtype=jnp.float32)
        self.forecast_basis = jnp.asarray(fb, dtype=jnp.float32)
        # Zero-extended K=2P bases so the kernel never slices theta:
        #   theta[:, P:]  -> backcast  => backcast basis occupies rows [P:2P]
        #   theta[:, :P]  -> forecast  => forecast basis occupies rows [0:P]
        back_full = np.zeros((2 * P, back_len), dtype=np.float32)
        back_full[P:2 * P, :] = bb
        fore_full = np.zeros((2 * P, fore_len), dtype=np.float32)
        fore_full[0:P, :] = fb
        # Note: casting bases to the compute dtype (e.g. bf16) is a documented
        # precision choice; f32 by default to match the PyTorch reference.
        self.back_basis_k = jnp.asarray(back_full, dtype=dtype)
        self.fore_basis_k = jnp.asarray(fore_full, dtype=dtype)

    def __call__(self, theta):
        return seasonality_basis_forward(
            theta,
            self.back_basis_k.astype(theta.dtype),
            self.fore_basis_k.astype(theta.dtype),
            block_b=self.block_b,
        )


if __name__ == "__main__":
    harmonics = 2
    backcast_size = 16
    forecast_size = 8

    module = SeasonalityBasis(harmonics, backcast_size, forecast_size)
    cut = module.cut_point  # = 14 for this config -> theta has 28 columns

    # Small deterministic check (single grid step).
    key = jax.random.PRNGKey(0)
    theta = jax.random.normal(key, (4, 2 * cut), dtype=jnp.float32)
    backcast, forecast = module(theta)
    backcast, forecast = jax.block_until_ready((backcast, forecast))

    ref_back = jnp.einsum("bp,pt->bt", theta[:, cut:], module.backcast_basis)
    ref_fore = jnp.einsum("bp,pt->bt", theta[:, :cut], module.forecast_basis)
    np.testing.assert_allclose(np.asarray(backcast), np.asarray(ref_back), rtol=1e-5, atol=1e-5)
    np.testing.assert_allclose(np.asarray(forecast), np.asarray(ref_fore), rtol=1e-5, atol=1e-5)

    # Second check exercising >1 grid step and a ragged (masked) final block.
    theta2 = jax.random.normal(jax.random.PRNGKey(1), (300, 2 * cut), dtype=jnp.float32)
    backcast2, forecast2 = module(theta2)
    backcast2, forecast2 = jax.block_until_ready((backcast2, forecast2))
    ref_back2 = jnp.einsum("bp,pt->bt", theta2[:, cut:], module.backcast_basis)
    ref_fore2 = jnp.einsum("bp,pt->bt", theta2[:, :cut], module.forecast_basis)
    np.testing.assert_allclose(np.asarray(backcast2), np.asarray(ref_back2), rtol=1e-5, atol=1e-5)
    np.testing.assert_allclose(np.asarray(forecast2), np.asarray(ref_fore2), rtol=1e-5, atol=1e-5)

    print("KERNEL_OK")
</pallas_src>

<mosaic_0001>
module attributes {stable_mosaic.version = 11 : i64} {
  func.func @_seasonality_kernel(%arg0: i32, %arg1: memref<4x28xf32, #tpu.memory_space<vmem>>, %arg2: memref<28x16xf32, #tpu.memory_space<vmem>>, %arg3: memref<28x8xf32, #tpu.memory_space<vmem>>, %arg4: memref<4x16xf32, #tpu.memory_space<vmem>>, %arg5: memref<4x8xf32, #tpu.memory_space<vmem>>) attributes {dimension_semantics = [#tpu.dimension_semantics<parallel>], iteration_bounds = array<i64: 1>, scalar_prefetch = 0 : i64, scratch_operands = 0 : i64, tpu.core_type = #tpu.core_type<tc>, window_params = [{transform_indices = @transform_0, window_bounds = array<i64: 4, 28>}, {pipeline_mode = #tpu.pipeline_mode<synchronous>, transform_indices = @transform_1, window_bounds = array<i64: 28, 16>}, {pipeline_mode = #tpu.pipeline_mode<synchronous>, transform_indices = @transform_2, window_bounds = array<i64: 28, 8>}, {transform_indices = @transform_3, window_bounds = array<i64: 4, 16>}, {transform_indices = @transform_4, window_bounds = array<i64: 4, 8>}]} {
    %c0 = arith.constant 0 : index
    %c0_0 = arith.constant 0 : index
    %0 = vector.load %arg1[%c0, %c0_0] : memref<4x28xf32, #tpu.memory_space<vmem>>, vector<4x28xf32>
    %c0_1 = arith.constant 0 : index
    %c0_2 = arith.constant 0 : index
    %1 = vector.load %arg2[%c0_1, %c0_2] : memref<28x16xf32, #tpu.memory_space<vmem>>, vector<28x16xf32>
    %cst = arith.constant dense<0.000000e+00> : vector<4x16xf32>
    %2 = tpu.matmul %0, %1, %cst {dimension_numbers = #tpu.dot_dimension_numbers<[1], [0], [0], [1], [0, 0, 1, 1], [], []>} : vector<4x28xf32>, vector<28x16xf32>, vector<4x16xf32> -> vector<4x16xf32>
    %c0_3 = arith.constant 0 : index
    %c0_4 = arith.constant 0 : index
    %3 = vector.load %arg4[%c0_3, %c0_4] : memref<4x16xf32, #tpu.memory_space<vmem>>, vector<4x16xf32>
    tpu.vector_store %arg4[%c0_3, %c0_4], %2 {strides = array<i32>} : memref<4x16xf32, #tpu.memory_space<vmem>>, vector<4x16xf32>,
    %c0_5 = arith.constant 0 : index
    %c0_6 = arith.constant 0 : index
    %4 = vector.load %arg3[%c0_5, %c0_6] : memref<28x8xf32, #tpu.memory_space<vmem>>, vector<28x8xf32>
    %cst_7 = arith.constant dense<0.000000e+00> : vector<4x8xf32>
    %5 = tpu.matmul %0, %4, %cst_7 {dimension_numbers = #tpu.dot_dimension_numbers<[1], [0], [0], [1], [0, 0, 1, 1], [], []>} : vector<4x28xf32>, vector<28x8xf32>, vector<4x8xf32> -> vector<4x8xf32>
    %c0_8 = arith.constant 0 : index
    %c0_9 = arith.constant 0 : index
    %6 = vector.load %arg5[%c0_8, %c0_9] : memref<4x8xf32, #tpu.memory_space<vmem>>, vector<4x8xf32>
    tpu.vector_store %arg5[%c0_8, %c0_9], %5 {strides = array<i32>} : memref<4x8xf32, #tpu.memory_space<vmem>>, vector<4x8xf32>,
    return
  }
  func.func @transform_0(%arg0: i32) -> (i32, i32) {
    %c0_i32 = arith.constant 0 : i32
    %c0_i32_0 = arith.constant 0 : i32
    return %arg0, %c0_i32 : i32, i32
  }
  func.func @transform_1(%arg0: i32) -> (i32, i32) {
    %c0_i32 = arith.constant 0 : i32
    %c0_i32_0 = arith.constant 0 : i32
    %c0_i32_1 = arith.constant 0 : i32
    return %c0_i32, %c0_i32_0 : i32, i32
  }
  func.func @transform_2(%arg0: i32) -> (i32, i32) {
    %c0_i32 = arith.constant 0 : i32
    %c0_i32_0 = arith.constant 0 : i32
    %c0_i32_1 = arith.constant 0 : i32
    return %c0_i32, %c0_i32_0 : i32, i32
  }
  func.func @transform_3(%arg0: i32) -> (i32, i32) {
    %c0_i32 = arith.constant 0 : i32
    %c0_i32_0 = arith.constant 0 : i32
    return %arg0, %c0_i32 : i32, i32
  }
  func.func @transform_4(%arg0: i32) -> (i32, i32) {
    %c0_i32 = arith.constant 0 : i32
    %c0_i32_0 = arith.constant 0 : i32
    return %arg0, %c0_i32 : i32, i32
  }
}

</mosaic_0001>

<bundles_post_ra>
// kernel: tpu_custom_call.1
= control target key start
LH: loop header
LB: loop body
LE: loop exit
PB: predicated region body
PF: predicated region fallthrough
CT: control target
= control target key end

     0   :  { %10 = vsyncpa [#allocation3], 0  ;;  %vm27_vm0 = vcmask 1043456   ;;  %v314_v3 = vmov 0.0|0.0   ;;  %vm315_vm1 = vmmov 0   ;;  %v316_v11 = vmov 0.0   ;;  %s404_s0 = inlined_call_operand.vmem [shape: f32[4,28], index: 0, kind: input, shape index: {}]   ;;  %s405_s1 = inlined_call_operand.vmem [shape: f32[28,16], index: 1, kind: input, shape index: {}]   ;;  %s406_s2 = inlined_call_operand.vmem [shape: f32[28,8], index: 2, kind: input, shape index: {}]   ;;  %s407_s3 = inlined_call_operand.hbm [shape: f32[4,16], index: 3, kind: output, shape index: {0}]   ;;  %s408_s4 = inlined_call_operand.hbm [shape: f32[4,8], index: 4, kind: output, shape index: {1}]  }
   0x1   :  { %v19_v0 = vld [vmem:[%s405_s1] sm:$0xff]  ;;  %v20_v1 = vld [vmem:[%s405_s1 + $0x8] sm:$0xff]  ;;  %246 = vmatprep.subr.bf16.mxu0 %v314_v3  ;;  %253 = vmatprep.subr.bf16.mxu1 %v314_v3  ;;  %v21_v6 = vld [vmem:[%s405_s1 + $0x10] sm:$0xff] }
   0x2   :  { %v103_v2 = vld [vmem:[%s406_s2] sm:$0xff]  ;;  %v247_v4 = vpack.c.bf16 %v20_v1, %v19_v0  ;;  %v104_v5 = vld [vmem:[%s406_s2 + $0x8] sm:$0xff]  ;;  %v22_v7 = vld [vmem:[%s405_s1 + $0x18] sm:$0xf]  ;;  %232 = vmatprep.mubr.msk.f32.mxu0 %vm315_vm1, %v316_v11  ;;  %243 = vmatprep.mubr.msk.f32.mxu1 %vm315_vm1, %v316_v11 }
   0x3   :  { %v254_v8 = vpack.c.bf16 %v104_v5, %v103_v2  ;;  %v105_v9 = vld [vmem:[%s406_s2 + $0x10] sm:$0xff]  ;;  %v106_v10 = vld [vmem:[%s406_s2 + $0x18] sm:$0xf]  ;;  %v250_v12 = vpack.c.bf16 %v22_v7, %v21_v6 }
   0x4   :  { %248 = vmatpush3.bf16.msra.mxu0 %v247_v4 }
   0x5   :  { %11 = vsyncpa [#allocation5], 0  ;;  %255 = vmatpush3.bf16.msra.mxu1 %v254_v8  ;;  %249 = vmatprep.subr.bf16.mxu0 %v314_v3  ;;  %vm317_vm2 = vmmov 1   ;;  %v257_v13 = vpack.c.bf16 %v106_v10, %v105_v9  ;;  %v18_v14 = vld [vmem:[%s404_s0] sm:$0xf]  ;;  %vm23_vm4 = vcmask 228352  }
   0x6   :  { %vm251_vm3 = vmpackc.low %vm27_vm0, %vm317_vm2  ;;  %256 = vmatprep.subr.bf16.mxu1 %v314_v3  ;;  %s318_s2 = smov [#allocation2]   ;;  %s319_s7 = smov [#allocation4]   ;;  %vm101_vm5 = vcmask 125952   ;;  %vm180_vm6 = vcmask 60416  }
   0x7   :  { %s188_s6 = sshll.u32 %s318_s2, 4  ;;  %s198_s8 = sshll.u32 %s319_s7, 4  ;;  %s189_s6 = int_to_ptr.vmem [resolvable:$true] %s188_s6  ;;  %s373_s8 = int_to_ptr.vmem [resolvable:$true] %s198_s8 }
   0x8   :  { %252 = vmatpush3.bf16.msk.msra.mxu0 %vm251_vm3, %v250_v12  ;;  %s266_s0 = scalar_lea.vmem %s189_s6, 64  ;;  %p271_p1 = scmp.lt.s32.totalorder %s189_s6, %s189_s6 }
   0x9   :  { %259 = vmatpush3.bf16.msk.msra.mxu1 %vm251_vm3, %v257_v13  ;;  %p267_p0 = scmp.ne.s32.totalorder %s189_s6, %s266_s0  ;;  %p272_p2 = scmp.lt.s32.totalorder %s266_s0, %s266_s0 }
   0xb   :  { %233 = vmatmul.mubr.msk.f32.vlgmr.msra.gmra.mrb[0].mxu0 %vm23_vm4, %v18_v14  ;;  %p273_p3 = por %p272_p2, %p271_p1 }
   0xc   :  { %244 = vmatmul.mubr.msk.f32.vlgmr.msra.gmra.mrb[0].mxu1 %vm23_vm4, %v18_v14 }
   0xd   :  { %p274_p4 = pnand %p273_p3, %p267_p0 }
  0xde   :  { %v97_v15 = vpop.f32.mrb[0].mxu0 }
  0xdf   :  { %v176_v16 = vpop.f32.mrb[0].mxu1  ;;  %v234_v17 = vpop.f32.mrb[1].mxu0  ;;  %102 = vst.msk [vmem:[#allocation2] sm:$0xf] %vm101_vm5, %v97_v15 }
  0xe0   :  { %181 = vst.msk [vmem:[#allocation4] sm:$0xf] %vm180_vm6, %v176_v16  ;;  %v245_v18 = vpop.f32.mrb[1].mxu1 }
  0xe1   :  { %277 = shalt.err (!%p274_p4)
}
  0xe2   :  { %s278_s11 = scalar_lea.hbm %s407_s3, 64 }
  0xe3   :  { %p279_p5 = scmp.ne.s32.totalorder %s407_s3, %s278_s11  ;;  %p282_p6 = scmp.lt.u32.totalorder %s278_s11, %s407_s3 }
  0xe5   :  { %p284_p7 = pnand %p282_p6, %p279_p5 }
  0xe7   :  { %287 = shalt.err (!%p284_p7)
}
  0xe8   :  { %191 = dma.vmem_to_hbm [thread:$0]  %s189_s6, 64, %s407_s3, [#allocation3]  }
  0xe9   :  { %s288_s18 = scalar_lea.vmem %s373_s8, 64  ;;  %p293_p9 = scmp.lt.s32.totalorder %s373_s8, %s373_s8 }
  0xea   :  { %p289_p8 = scmp.ne.s32.totalorder %s373_s8, %s288_s18  ;;  %p294_p10 = scmp.lt.s32.totalorder %s288_s18, %s288_s18 }
  0xec   :  { %p295_p11 = por %p294_p10, %p293_p9 }
  0xee   :  { %p296_p12 = pnand %p295_p11, %p289_p8 }
  0xf0   :  { %299 = shalt.err (!%p296_p12)
}
  0xf1   :  { %s300_s21 = scalar_lea.hbm %s408_s4, 64 }
  0xf2   :  { %p301_p13 = scmp.ne.s32.totalorder %s408_s4, %s300_s21  ;;  %p304_p0 = scmp.lt.u32.totalorder %s300_s21, %s408_s4 }
  0xf4   :  { %p306_p1 = pnand %p304_p0, %p301_p13 }
  0xf6   :  { %309 = shalt.err (!%p306_p1)
}
  0xf7   :  { %201 = dma.vmem_to_hbm [thread:$0]  %s373_s8, 64, %s408_s4, [#allocation5]  }
  0xf8   :  { %310 = dma.done.wait [#allocation3], 64  }
  0xf9   :  { %311 = vsyncadd [#allocation3], 4294967232 }
  0xfa   :  { %312 = dma.done.wait [#allocation5], 64  }
  0xfb   :  { %313 = vsyncadd [#allocation5], 4294967232 }
  0xfc   :  { %208 = vsyncpa [#allocation3], 1 }
  0xfd   :  { %209 = vsyncpa [#allocation5], 1 }

</bundles_post_ra>
